<compile_context>
chip_gen: v7x
topology: tpu7x:2x2x1
jax: 0.10.0
libtpu: 0.0.40
codegen_flags: <defaults>
</compile_context>

<pallas_src>
import functools
import numpy as np
import jax
import jax.numpy as jnp
from jax.experimental import pallas as pl
from jax.experimental.pallas import tpu as pltpu  # noqa: F401

BATCH = 2
SEQ = 8
EMBED = 32
HEADS = 4
HEAD_DIM = EMBED // HEADS


def mha_kernel(qkv_ref, mask_ref, wqkv_ref, wfc_ref, bfc_ref, out_ref,
               *, n, s, h, d, e):
    f32 = jnp.float32
    scale = 1.0 / jnp.sqrt(f32(e))

    # ---- fused Q/K/V projections: one (N*H*S, D) @ (D, D) matmul each -------------------
    # rows arrive head-major: row index = ((n*H + h)*S + q)
    qp = jnp.dot(qkv_ref[0], wqkv_ref[0], preferred_element_type=f32)    # (N*H*S, D)
    kp = jnp.dot(qkv_ref[1], wqkv_ref[1], preferred_element_type=f32)
    vp = jnp.dot(qkv_ref[2], wqkv_ref[2], preferred_element_type=f32)

    # leading-dim splits only (free, no relayout)
    q4 = qp.reshape(n * h, s, d)
    k4 = kp.reshape(n * h, s, d)
    v4 = vp.reshape(n * h, s, d)

    # ---- attention scores for all batches & heads in one batched contraction ------------
    energy = jnp.einsum('bqd,bkd->bqk', q4, k4,
                        preferred_element_type=f32).reshape(n, h, s, s)

    # additive mask bias, applied once (== masked_fill(mask == 0, -1e20))
    bias = jnp.where(mask_ref[...] == 0.0, f32(-1e20), f32(0.0))          # (N, S)
    logits = (energy + bias[:, None, None, :]) * scale

    # ---- hand-rolled softmax; the divide goes to the EUP via approx reciprocal ----------
    m = jnp.max(logits, axis=-1, keepdims=True)
    p = jnp.exp(logits - m)
    denom = jnp.sum(p, axis=-1, keepdims=True)
    attn = p * pl.reciprocal(denom, approx=True)                          # (N, H, S, S)

    ctx = jnp.einsum('bqk,bkd->bqd', attn.reshape(n * h, s, s), v4,
                     preferred_element_type=f32).reshape(n, h, s, d)      # (N, H, S, D)

    # ---- fc_out with the head concat folded into the contraction ------------------------
    wfc3 = wfc_ref[...].reshape(h, d, e)                                  # (H, D, E)
    acc = jnp.dot(ctx[:, 0].reshape(n * s, d), wfc3[0], preferred_element_type=f32)
    for hh in range(1, h):
        acc = acc + jnp.dot(ctx[:, hh].reshape(n * s, d), wfc3[hh],
                            preferred_element_type=f32)

    out_ref[...] = (acc + bfc_ref[...]).astype(out_ref.dtype)             # (N*S, E)


@jax.jit
def multi_head_attention(values, keys, queries, mask, params):
    """values/keys/queries: (N, S, E); mask: (N, 1, 1, S) with 1.0=attend, 0.0=masked."""
    N, S, E = queries.shape

    # pack q/k/v and split heads with ONE transpose; rows ordered (batch, head, position)
    qkv = (jnp.stack([queries, keys, values])                              # (3, N, S, E)
              .reshape(3, N, S, HEADS, HEAD_DIM)
              .transpose(0, 1, 3, 2, 4)                                    # (3, N, H, S, D)
              .reshape(3, N * HEADS * S, HEAD_DIM))

    wqkv = jnp.stack([params["wq"], params["wk"], params["wv"]])           # (3, D, D)

    kernel = functools.partial(mha_kernel, n=N, s=S, h=HEADS, d=HEAD_DIM, e=E)
    out_flat = pl.pallas_call(
        kernel,
        out_shape=jax.ShapeDtypeStruct((N * S, E), queries.dtype),
    )(qkv,
      mask.reshape(N, S).astype(jnp.float32),
      wqkv,
      params["wfc"],
      params["bfc"])
    return out_flat.reshape(N, S, E)


# ---------------- pure-JAX reference (mirrors the PyTorch forward) ----------------
def reference(values, keys, queries, mask, p):
    N, S, E = queries.shape
    q4 = queries.reshape(N, S, HEADS, HEAD_DIM) @ p["wq"]
    k4 = keys.reshape(N, S, HEADS, HEAD_DIM) @ p["wk"]
    v4 = values.reshape(N, S, HEADS, HEAD_DIM) @ p["wv"]
    energy = jnp.einsum('nqhd,nkhd->nhqk', q4, k4)
    energy = jnp.where(mask == 0.0, -1e20, energy)            # mask: (N,1,1,S)
    attn = jax.nn.softmax(energy / jnp.sqrt(jnp.float32(E)), axis=3)
    out = jnp.einsum('nhql,nlhd->nqhd', attn, v4).reshape(N, S, E)
    return out @ p["wfc"] + p["bfc"][0]


def init_params(key):
    ks = jax.random.split(key, 5)
    return {
        # per-head projections (shared across heads), stored pre-transposed as (in, out)
        "wq": jax.random.normal(ks[0], (HEAD_DIM, HEAD_DIM), jnp.float32) * 0.1,
        "wk": jax.random.normal(ks[1], (HEAD_DIM, HEAD_DIM), jnp.float32) * 0.1,
        "wv": jax.random.normal(ks[2], (HEAD_DIM, HEAD_DIM), jnp.float32) * 0.1,
        # fc_out, stored pre-transposed as (in, out), plus its bias
        "wfc": jax.random.normal(ks[3], (EMBED, EMBED), jnp.float32) * 0.1,
        "bfc": jax.random.normal(ks[4], (1, EMBED), jnp.float32) * 0.1,
    }


if __name__ == "__main__":
    key = jax.random.PRNGKey(0)
    kv, kk, kq, kp = jax.random.split(key, 4)

    values = jax.random.normal(kv, (BATCH, SEQ, EMBED), jnp.float32)
    keys = jax.random.normal(kk, (BATCH, SEQ, EMBED), jnp.float32)
    queries = jax.random.normal(kq, (BATCH, SEQ, EMBED), jnp.float32)

    # mask: attend everywhere except the last key position of batch element 1
    mask = jnp.ones((BATCH, 1, 1, SEQ), jnp.float32)
    mask = mask.at[1, 0, 0, SEQ - 1].set(0.0)

    params = init_params(kp)

    out = jax.block_until_ready(multi_head_attention(values, keys, queries, mask, params))
    ref = jax.block_until_ready(reference(values, keys, queries, mask, params))
    np.testing.assert_allclose(np.asarray(out), np.asarray(ref), rtol=2e-3, atol=2e-3)

    print("KERNEL_OK")
</pallas_src>

<mosaic_0001>
module attributes {stable_mosaic.version = 11 : i64} {
  func.func @mha_kernel(%arg0: memref<3x64x8xf32, #tpu.memory_space<vmem>>, %arg1: memref<2x8xf32, #tpu.memory_space<vmem>>, %arg2: memref<3x8x8xf32, #tpu.memory_space<vmem>>, %arg3: memref<32x32xf32, #tpu.memory_space<vmem>>, %arg4: memref<1x32xf32, #tpu.memory_space<vmem>>, %arg5: memref<16x32xf32, #tpu.memory_space<vmem>>) attributes {dimension_semantics = [], scalar_prefetch = 0 : i64, scratch_operands = 0 : i64, tpu.core_type = #tpu.core_type<tc>} {
    %cst = arith.constant 3.200000e+01 : f32
    %0 = math.sqrt %cst : f32
    %cst_0 = arith.constant 1.000000e+00 : f32
    %1 = arith.divf %cst_0, %0 : f32
    %c0 = arith.constant 0 : index
    %c0_1 = arith.constant 0 : index
    %c0_2 = arith.constant 0 : index
    %2 = vector.load %arg0[%c0, %c0_1, %c0_2] : memref<3x64x8xf32, #tpu.memory_space<vmem>>, vector<1x64x8xf32>
    %3 = vector.shape_cast %2 : vector<1x64x8xf32> to vector<64x8xf32>
    %c0_3 = arith.constant 0 : index
    %c0_4 = arith.constant 0 : index
    %c0_5 = arith.constant 0 : index
    %4 = vector.load %arg2[%c0_3, %c0_4, %c0_5] : memref<3x8x8xf32, #tpu.memory_space<vmem>>, vector<1x8x8xf32>
    %5 = vector.shape_cast %4 : vector<1x8x8xf32> to vector<8x8xf32>
    %cst_6 = arith.constant dense<0.000000e+00> : vector<64x8xf32>
    %6 = tpu.matmul %3, %5, %cst_6 {dimension_numbers = #tpu.dot_dimension_numbers<[1], [0], [0], [1], [0, 0, 1, 1], [], []>} : vector<64x8xf32>, vector<8x8xf32>, vector<64x8xf32> -> vector<64x8xf32>
    %c1 = arith.constant 1 : index
    %c0_7 = arith.constant 0 : index
    %c0_8 = arith.constant 0 : index
    %7 = vector.load %arg0[%c1, %c0_7, %c0_8] : memref<3x64x8xf32, #tpu.memory_space<vmem>>, vector<1x64x8xf32>
    %8 = vector.shape_cast %7 : vector<1x64x8xf32> to vector<64x8xf32>
    %c1_9 = arith.constant 1 : index
    %c0_10 = arith.constant 0 : index
    %c0_11 = arith.constant 0 : index
    %9 = vector.load %arg2[%c1_9, %c0_10, %c0_11] : memref<3x8x8xf32, #tpu.memory_space<vmem>>, vector<1x8x8xf32>
    %10 = vector.shape_cast %9 : vector<1x8x8xf32> to vector<8x8xf32>
    %cst_12 = arith.constant dense<0.000000e+00> : vector<64x8xf32>
    %11 = tpu.matmul %8, %10, %cst_12 {dimension_numbers = #tpu.dot_dimension_numbers<[1], [0], [0], [1], [0, 0, 1, 1], [], []>} : vector<64x8xf32>, vector<8x8xf32>, vector<64x8xf32> -> vector<64x8xf32>
    %c2 = arith.constant 2 : index
    %c0_13 = arith.constant 0 : index
    %c0_14 = arith.constant 0 : index
    %12 = vector.load %arg0[%c2, %c0_13, %c0_14] : memref<3x64x8xf32, #tpu.memory_space<vmem>>, vector<1x64x8xf32>
    %13 = vector.shape_cast %12 : vector<1x64x8xf32> to vector<64x8xf32>
    %c2_15 = arith.constant 2 : index
    %c0_16 = arith.constant 0 : index
    %c0_17 = arith.constant 0 : index
    %14 = vector.load %arg2[%c2_15, %c0_16, %c0_17] : memref<3x8x8xf32, #tpu.memory_space<vmem>>, vector<1x8x8xf32>
    %15 = vector.shape_cast %14 : vector<1x8x8xf32> to vector<8x8xf32>
    %cst_18 = arith.constant dense<0.000000e+00> : vector<64x8xf32>
    %16 = tpu.matmul %13, %15, %cst_18 {dimension_numbers = #tpu.dot_dimension_numbers<[1], [0], [0], [1], [0, 0, 1, 1], [], []>} : vector<64x8xf32>, vector<8x8xf32>, vector<64x8xf32> -> vector<64x8xf32>
    %17 = vector.shape_cast %6 : vector<64x8xf32> to vector<8x8x8xf32>
    %18 = vector.shape_cast %11 : vector<64x8xf32> to vector<8x8x8xf32>
    %19 = vector.shape_cast %16 : vector<64x8xf32> to vector<8x8x8xf32>
    "tpu.trace_start"() <{level = 10 : i32, message = "bqd,bkd->bqk"}> : () -> ()
    %cst_19 = arith.constant dense<0.000000e+00> : vector<8x8x8xf32>
    %20 = tpu.matmul %17, %18, %cst_19 {dimension_numbers = #tpu.dot_dimension_numbers<[2], [2], [1], [1], [0, 0, 0, 1, 1, 1], [0], [0]>} : vector<8x8x8xf32>, vector<8x8x8xf32>, vector<8x8x8xf32> -> vector<8x8x8xf32>
    "tpu.trace_stop"() : () -> ()
    %21 = vector.shape_cast %20 : vector<8x8x8xf32> to vector<2x4x8x8xf32>
    %c0_20 = arith.constant 0 : index
    %c0_21 = arith.constant 0 : index
    %22 = vector.load %arg1[%c0_20, %c0_21] : memref<2x8xf32, #tpu.memory_space<vmem>>, vector<2x8xf32>
    %cst_22 = arith.constant 0.000000e+00 : f32
    %23 = vector.broadcast %cst_22 : f32 to vector<2x8xf32>
    %24 = arith.cmpf oeq, %22, %23 : vector<2x8xf32>
    %cst_23 = arith.constant -1.000000e+20 : f32
    %cst_24 = arith.constant 0.000000e+00 : f32
    %25 = vector.broadcast %cst_23 : f32 to vector<2x8xf32>
    %26 = vector.broadcast %cst_24 : f32 to vector<2x8xf32>
    %27 = arith.select %24, %25, %26 : vector<2x8xi1>, vector<2x8xf32>
    %28 = vector.shape_cast %27 : vector<2x8xf32> to vector<2x1x1x8xf32>
    %29 = vector.broadcast %28 : vector<2x1x1x8xf32> to vector<2x4x8x8xf32>
    %30 = arith.addf %21, %29 : vector<2x4x8x8xf32>
    %31 = vector.broadcast %1 : f32 to vector<2x4x8x8xf32>
    %32 = arith.mulf %30, %31 : vector<2x4x8x8xf32>
    %cst_25 = arith.constant dense<0xFF800000> : vector<2x4x8xf32>
    %33 = vector.multi_reduction <maximumf>, %32, %cst_25 [3] : vector<2x4x8x8xf32> to vector<2x4x8xf32>
    %34 = vector.shape_cast %33 : vector<2x4x8xf32> to vector<2x4x8x1xf32>
    %35 = vector.broadcast %34 : vector<2x4x8x1xf32> to vector<2x4x8x8xf32>
    %36 = arith.subf %32, %35 : vector<2x4x8x8xf32>
    %37 = math.exp %36 : vector<2x4x8x8xf32>
    %cst_26 = arith.constant dense<0.000000e+00> : vector<2x4x8xf32>
    %38 = vector.multi_reduction <add>, %37, %cst_26 [3] : vector<2x4x8x8xf32> to vector<2x4x8xf32>
    %39 = vector.shape_cast %38 : vector<2x4x8xf32> to vector<2x4x8x1xf32>
    %40 = tpu.reciprocal %39 {approx = true} : vector<2x4x8x1xf32> -> vector<2x4x8x1xf32>
    %41 = vector.broadcast %40 : vector<2x4x8x1xf32> to vector<2x4x8x8xf32>
    %42 = arith.mulf %37, %41 : vector<2x4x8x8xf32>
    %43 = vector.shape_cast %42 : vector<2x4x8x8xf32> to vector<8x8x8xf32>
    "tpu.trace_start"() <{level = 10 : i32, message = "bqk,bkd->bqd"}> : () -> ()
    %cst_27 = arith.constant dense<0.000000e+00> : vector<8x8x8xf32>
    %44 = tpu.matmul %43, %19, %cst_27 {dimension_numbers = #tpu.dot_dimension_numbers<[2], [1], [1], [2], [0, 0, 0, 1, 1, 2], [0], [0]>} : vector<8x8x8xf32>, vector<8x8x8xf32>, vector<8x8x8xf32> -> vector<8x8x8xf32>
    "tpu.trace_stop"() : () -> ()
    %45 = vector.shape_cast %44 : vector<8x8x8xf32> to vector<2x4x8x8xf32>
    %c0_28 = arith.constant 0 : index
    %c0_29 = arith.constant 0 : index
    %46 = vector.load %arg3[%c0_28, %c0_29] : memref<32x32xf32, #tpu.memory_space<vmem>>, vector<32x32xf32>
    %47 = vector.shape_cast %46 : vector<32x32xf32> to vector<4x8x32xf32>
    %48 = vector.extract_strided_slice %45 {offsets = [0, 0, 0, 0], sizes = [2, 1, 8, 8], strides = [1, 1, 1, 1]} : vector<2x4x8x8xf32> to vector<2x1x8x8xf32>
    %49 = vector.shape_cast %48 : vector<2x1x8x8xf32> to vector<2x8x8xf32>
    %50 = vector.shape_cast %49 : vector<2x8x8xf32> to vector<16x8xf32>
    %51 = vector.extract_strided_slice %47 {offsets = [0, 0, 0], sizes = [1, 8, 32], strides = [1, 1, 1]} : vector<4x8x32xf32> to vector<1x8x32xf32>
    %52 = vector.shape_cast %51 : vector<1x8x32xf32> to vector<8x32xf32>
    %cst_30 = arith.constant dense<0.000000e+00> : vector<16x32xf32>
    %53 = tpu.matmul %50, %52, %cst_30 {dimension_numbers = #tpu.dot_dimension_numbers<[1], [0], [0], [1], [0, 0, 1, 1], [], []>} : vector<16x8xf32>, vector<8x32xf32>, vector<16x32xf32> -> vector<16x32xf32>
    %54 = vector.extract_strided_slice %45 {offsets = [0, 1, 0, 0], sizes = [2, 1, 8, 8], strides = [1, 1, 1, 1]} : vector<2x4x8x8xf32> to vector<2x1x8x8xf32>
    %55 = vector.shape_cast %54 : vector<2x1x8x8xf32> to vector<2x8x8xf32>
    %56 = vector.shape_cast %55 : vector<2x8x8xf32> to vector<16x8xf32>
    %57 = vector.extract_strided_slice %47 {offsets = [1, 0, 0], sizes = [1, 8, 32], strides = [1, 1, 1]} : vector<4x8x32xf32> to vector<1x8x32xf32>
    %58 = vector.shape_cast %57 : vector<1x8x32xf32> to vector<8x32xf32>
    %cst_31 = arith.constant dense<0.000000e+00> : vector<16x32xf32>
    %59 = tpu.matmul %56, %58, %cst_31 {dimension_numbers = #tpu.dot_dimension_numbers<[1], [0], [0], [1], [0, 0, 1, 1], [], []>} : vector<16x8xf32>, vector<8x32xf32>, vector<16x32xf32> -> vector<16x32xf32>
    %60 = arith.addf %53, %59 : vector<16x32xf32>
    %61 = vector.extract_strided_slice %45 {offsets = [0, 2, 0, 0], sizes = [2, 1, 8, 8], strides = [1, 1, 1, 1]} : vector<2x4x8x8xf32> to vector<2x1x8x8xf32>
    %62 = vector.shape_cast %61 : vector<2x1x8x8xf32> to vector<2x8x8xf32>
    %63 = vector.shape_cast %62 : vector<2x8x8xf32> to vector<16x8xf32>
    %64 = vector.extract_strided_slice %47 {offsets = [2, 0, 0], sizes = [1, 8, 32], strides = [1, 1, 1]} : vector<4x8x32xf32> to vector<1x8x32xf32>
    %65 = vector.shape_cast %64 : vector<1x8x32xf32> to vector<8x32xf32>
    %cst_32 = arith.constant dense<0.000000e+00> : vector<16x32xf32>
    %66 = tpu.matmul %63, %65, %cst_32 {dimension_numbers = #tpu.dot_dimension_numbers<[1], [0], [0], [1], [0, 0, 1, 1], [], []>} : vector<16x8xf32>, vector<8x32xf32>, vector<16x32xf32> -> vector<16x32xf32>
    %67 = arith.addf %60, %66 : vector<16x32xf32>
    %68 = vector.extract_strided_slice %45 {offsets = [0, 3, 0, 0], sizes = [2, 1, 8, 8], strides = [1, 1, 1, 1]} : vector<2x4x8x8xf32> to vector<2x1x8x8xf32>
    %69 = vector.shape_cast %68 : vector<2x1x8x8xf32> to vector<2x8x8xf32>
    %70 = vector.shape_cast %69 : vector<2x8x8xf32> to vector<16x8xf32>
    %71 = vector.extract_strided_slice %47 {offsets = [3, 0, 0], sizes = [1, 8, 32], strides = [1, 1, 1]} : vector<4x8x32xf32> to vector<1x8x32xf32>
    %72 = vector.shape_cast %71 : vector<1x8x32xf32> to vector<8x32xf32>
    %cst_33 = arith.constant dense<0.000000e+00> : vector<16x32xf32>
    %73 = tpu.matmul %70, %72, %cst_33 {dimension_numbers = #tpu.dot_dimension_numbers<[1], [0], [0], [1], [0, 0, 1, 1], [], []>} : vector<16x8xf32>, vector<8x32xf32>, vector<16x32xf32> -> vector<16x32xf32>
    %74 = arith.addf %67, %73 : vector<16x32xf32>
    %c0_34 = arith.constant 0 : index
    %c0_35 = arith.constant 0 : index
    %75 = vector.load %arg4[%c0_34, %c0_35] : memref<1x32xf32, #tpu.memory_space<vmem>>, vector<1x32xf32>
    %76 = vector.broadcast %75 : vector<1x32xf32> to vector<16x32xf32>
    %77 = arith.addf %74, %76 : vector<16x32xf32>
    %c0_36 = arith.constant 0 : index
    %c0_37 = arith.constant 0 : index
    %78 = vector.load %arg5[%c0_36, %c0_37] : memref<16x32xf32, #tpu.memory_space<vmem>>, vector<16x32xf32>
    tpu.vector_store %arg5[%c0_36, %c0_37], %77 {strides = array<i32>} : memref<16x32xf32, #tpu.memory_space<vmem>>, vector<16x32xf32>,
    return
  }
}

</mosaic_0001>

<bundles_post_ra>
// kernel: multi_head_attention.1
= control target key start
LH: loop header
LB: loop body
LE: loop exit
PB: predicated region body
PF: predicated region fallthrough
CT: control target
= control target key end

     0   :  { %vm30_vm0 = vcmask 64512   ;;  %s2776_s0 = inlined_call_operand.vmem [shape: f32[3,64,8], index: 0, kind: input, shape index: {}]   ;;  %s2777_s1 = inlined_call_operand.vmem [shape: f32[2,8], index: 1, kind: input, shape index: {}]   ;;  %s2778_s2 = inlined_call_operand.vmem [shape: f32[3,8,8], index: 2, kind: input, shape index: {}]   ;;  %s2779_s3 = inlined_call_operand.vmem [shape: f32[32,32], index: 3, kind: input, shape index: {}]   ;;  %s2780_s4 = inlined_call_operand.vmem [shape: f32[1,32], index: 4, kind: input, shape index: {}]   ;;  %s2781_s5 = inlined_call_operand.hbm [shape: f32[16,32], index: 5, kind: output, shape index: {}]  }
   0x1   :  { %v29_v0 = vld [vmem:[%s2778_s2] sm:$0xff]  ;;  %v26_v2 = vld [vmem:[%s2776_s0 + $0x28] sm:$0xff]  ;;  %v27_v3 = vld [vmem:[%s2776_s0 + $0x30] sm:$0xff] }
   0x2   :  { %v25_v1 = vld [vmem:[%s2776_s0 + $0x20] sm:$0xff]  ;;  %2420 = vmatprep.subr.mxu1 %v29_v0  ;;  %v2148_v4 = vld [vmem:[%s2778_s2 + $0x8] sm:$0xff]  ;;  %2278 = vmatprep.subr.mxu0 %v29_v0  ;;  %v28_v7 = vld [vmem:[%s2776_s0 + $0x38] sm:$0xff] }
   0x3   :  { %2286 = vmatprep.mubr.msk.f32.mxu1 %vm30_vm0, %v25_v1  ;;  %2421 = vmatpush3.msra.mxu1 %v29_v0  ;;  %v21_v5 = vld [vmem:[%s2776_s0] sm:$0xff]  ;;  %v22_v6 = vld [vmem:[%s2776_s0 + $0x8] sm:$0xff]  ;;  %v23_v8 = vld [vmem:[%s2776_s0 + $0x10] sm:$0xff] }
   0x4   :  { %2287 = vmatmul.mubr.msk.f32.vlgmr.msra.gmra.mrb[0].mxu1 %vm30_vm0, %v26_v2  ;;  %2292 = vmatprep.subr.mxu1 %v2148_v4  ;;  %v2140_v9 = vld [vmem:[%s2776_s0 + $0x40] sm:$0xff] }
   0x5   :  { %2289 = vmatprep.mubr.msk.f32.mxu1 %vm30_vm0, %v27_v3  ;;  %2293 = vmatpush3.msra.mxu1 %v2148_v4 }
   0x6   :  { %2279 = vmatpush3.msra.mxu0 %v29_v0  ;;  %2280 = vmatprep.mubr.msk.f32.mxu0 %vm30_vm0, %v21_v5 }
   0x7   :  { %2281 = vmatmul.mubr.msk.f32.vlgmr.msra.gmra.mrb[0].mxu0 %vm30_vm0, %v22_v6 }
   0x8   :  { %10 = vsyncpa [#allocation3], 0  ;;  %2290 = vmatmul.mubr.msk.f32.gmra.mrb[2].mxu1 %vm30_vm0, %v28_v7  ;;  %2283 = vmatprep.mubr.msk.f32.mxu0 %vm30_vm0, %v23_v8  ;;  %v24_v10 = vld [vmem:[%s2776_s0 + $0x18] sm:$0xff]  ;;  %v2141_v11 = vld [vmem:[%s2776_s0 + $0x48] sm:$0xff]  ;;  %v2490_v23 = vmov 0.0   ;;  %vm2491_vm1 = vmmov 0   ;;  %v1055_v54 = vlaneseq }
   0x9   :  { %2294 = vmatprep.mubr.msk.f32.mxu1 %vm30_vm0, %v2140_v9  ;;  %v2142_v12 = vld [vmem:[%s2776_s0 + $0x50] sm:$0xff]  ;;  %v2143_v13 = vld [vmem:[%s2776_s0 + $0x58] sm:$0xff]  ;;  %v2144_v14 = vld [vmem:[%s2776_s0 + $0x60] sm:$0xff]  ;;  %2320 = vmatprep.subr.mxu1 %v2490_v23  ;;  %v2492_v52 = vmov 1966171168   ;;  %vm2113_vm3 = vcmask 261120  }
   0xa   :  { %v2145_v15 = vld [vmem:[%s2776_s0 + $0x68] sm:$0xff]  ;;  %v2146_v16 = vld [vmem:[%s2776_s0 + $0x70] sm:$0xff]  ;;  %v2147_v17 = vld [vmem:[%s2776_s0 + $0x78] sm:$0xff]  ;;  %v1053_v53 = vunpack.c.l.s4 %v2492_v52  ;;  %v1056_v57 = vshrl.u32 %v1055_v54, 7 }
   0xb   :  { %2284 = vmatmul.mubr.msk.f32.gmra.mrb[2].mxu0 %vm30_vm0, %v24_v10  ;;  %v2165_v18 = vld [vmem:[%s2778_s2 + $0x10] sm:$0xff]  ;;  %v2157_v19 = vld [vmem:[%s2776_s0 + $0x80] sm:$0xff]  ;;  %v2158_v20 = vld [vmem:[%s2776_s0 + $0x88] sm:$0xff] }
   0xc   :  { %2295 = vmatmul.mubr.msk.f32.vlgmr.msra.gmra.mrb[4].mxu1 %vm30_vm0, %v2141_v11  ;;  %2306 = vmatprep.subr.mxu0 %v2165_v18  ;;  %v2159_v21 = vld [vmem:[%s2776_s0 + $0x90] sm:$0xff]  ;;  %v2160_v22 = vld [vmem:[%s2776_s0 + $0x98] sm:$0xff]  ;;  %v2161_v24 = vld [vmem:[%s2776_s0 + $0xa0] sm:$0xff]  ;;  %v1054_v56 = vunpack.c.0.s8 %v1053_v53  ;;  %v1076_v62 = vsub.s32 0, %v1056_v57 }
   0xd   :  { %2297 = vmatprep.mubr.msk.f32.mxu1 %vm30_vm0, %v2142_v12  ;;  %2307 = vmatpush3.msra.mxu0 %v2165_v18  ;;  %v2162_v25 = vld [vmem:[%s2776_s0 + $0xa8] sm:$0xff]  ;;  %v2163_v26 = vld [vmem:[%s2776_s0 + $0xb0] sm:$0xff]  ;;  %v2164_v27 = vld [vmem:[%s2776_s0 + $0xb8] sm:$0xff] }
   0xe   :  { %2308 = vmatprep.mubr.msk.f32.mxu0 %vm30_vm0, %v2157_v19  ;;  %2340 = vmatprep.subr.mxu0 %v2490_v23  ;;  %v1048_v55 = vld [vmem:[%s2777_s1] sm:$0x3]  ;;  %v1057_v58 = vsub.s32 %v1054_v56, %v1056_v57 }
   0xf   :  { %2309 = vmatmul.mubr.msk.f32.vlgmr.msra.gmra.mrb[4].mxu0 %vm30_vm0, %v2158_v20  ;;  %vm1049_vm2 = vcmp.eq.f32.partialorder %v1048_v55, 0.0 }
  0x10   :  { %2298 = vmatmul.mubr.msk.f32.gmra.mrb[6].mxu1 %vm30_vm0, %v2143_v13  ;;  %2311 = vmatprep.mubr.msk.f32.mxu0 %vm30_vm0, %v2159_v21  ;;  %v1050_v59 = vsel %vm1049_vm2, -1e+20, %v2490_v23 }
  0x11   :  { %2300 = vmatprep.mubr.msk.f32.mxu1 %vm30_vm0, %v2144_v14  ;;  %v1058_v60 = vrot.slane %v1050_v59, %v1057_v58 }
  0x13   :  { %2312 = vmatmul.mubr.msk.f32.gmra.mrb[6].mxu0 %vm30_vm0, %v2160_v22  ;;  %v1066_v61 = vrot.slane %v1058_v60, %v1057_v58  ;;  %v1059_v5 = vcombine.high %v1058_v60, %v1058_v60 }
  0x14   :  { %2301 = vmatmul.mubr.msk.f32.gmra.mrb[8].mxu1 %vm30_vm0, %v2145_v15  ;;  %2314 = vmatprep.mubr.msk.f32.mxu0 %vm30_vm0, %v2161_v24 }
  0x15   :  { %2303 = vmatprep.mubr.msk.f32.mxu1 %vm30_vm0, %v2146_v16  ;;  %v1077_v63 = vrot.slane %v1066_v61, %v1076_v62  ;;  %v1073_v11 = vrot.slane %v1059_v5, %v1057_v58 }
  0x17   :  { %2315 = vmatmul.mubr.msk.f32.gmra.mrb[8].mxu0 %vm30_vm0, %v2162_v25  ;;  %v1081_v16 = vrot.slane %v1073_v11, %v1076_v62 }
  0x18   :  { %2304 = vmatmul.mubr.msk.f32.gmra.mrb[10].mxu1 %vm30_vm0, %v2147_v17  ;;  %2317 = vmatprep.mubr.msk.f32.mxu0 %vm30_vm0, %v2163_v26 }
  0x19   :  { %2322 = vmatprep.mubr.msk.f32.mxu1 %vm2491_vm1, %v2490_v23 }
  0x1b   :  { %2318 = vmatmul.mubr.msk.f32.gmra.mrb[10].mxu0 %vm30_vm0, %v2164_v27 }
  0x1c   :  { %2342 = vmatprep.mubr.msk.f32.mxu0 %vm2491_vm1, %v2490_v23 }
  0xd7   :  { %v2288_v28 = vpop.f32.mrb[0].mxu1 }
  0xd8   :  { %v141_v29 = vpop.f32.mrb[1].mxu1 }
  0xda   :  { %v2282_v30 = vpop.f32.mrb[0].mxu0 }
  0xdb   :  { %v2291_v31 = vpop.f32.mrb[2].mxu1  ;;  %v121_v32 = vpop.f32.mrb[1].mxu0 }
  0xdc   :  { %v151_v33 = vpop.f32.mrb[3].mxu1 }
  0xde   :  { %v2285_v34 = vpop.f32.mrb[2].mxu0 }
  0xdf   :  { %v2296_v35 = vpop.f32.mrb[4].mxu1  ;;  %v131_v36 = vpop.f32.mrb[3].mxu0 }
  0xe0   :  { %v261_v37 = vpop.f32.mrb[5].mxu1 }
  0xe1   :  { %2321 = vmatpush3.xpose.msk.msra.mxu1 %vm30_vm0, %v261_v37 }
  0xe2   :  { %2325 = vmatprep.subr.mxu1 %v2490_v23  ;;  %v2310_v44 = vpop.f32.mrb[4].mxu0 }
  0xe3   :  { %v2299_v38 = vpop.f32.mrb[6].mxu1  ;;  %v401_v45 = vpop.f32.mrb[5].mxu0 }
  0xe4   :  { %2323 = vmatmul.mubr.msk.f32.vlgmr.msra.gmra.mrb[12].mxu1 %vm30_vm0, %v121_v32  ;;  %v271_v39 = vpop.f32.mrb[7].mxu1 }
  0xe5   :  { %2326 = vmatpush3.xpose.msk.msra.mxu1 %vm30_vm0, %v2296_v35  ;;  %2327 = vmatprep.mubr.msk.f32.mxu1 %vm2491_vm1, %v2490_v23 }
  0xe6   :  { %2330 = vmatprep.subr.mxu1 %v2490_v23  ;;  %v2678_v46 = vpop.f32.mrb[6].mxu0 }
  0xe7   :  { %v2302_v40 = vpop.f32.mrb[8].mxu1  ;;  %v2680_v47 = vpop.f32.mrb[7].mxu0 }
  0xe8   :  { %v281_v41 = vpop.f32.mrb[9].mxu1  ;;  %2328 = vmatmul.mubr.msk.f32.vlgmr.msra.gmra.mrb[14].mxu1 %vm30_vm0, %v2282_v30 }
  0xe9   :  { %2331 = vmatpush3.xpose.msk.msra.mxu1 %vm30_vm0, %v271_v39  ;;  %2341 = vmatpush3.xpose.msk.msra.mxu0 %vm30_vm0, %v281_v41 }
  0xea   :  { %2332 = vmatprep.mubr.msk.f32.mxu1 %vm2491_vm1, %v2490_v23  ;;  %2335 = vmatprep.subr.mxu1 %v2490_v23  ;;  %v2683_v48 = vpop.f32.mrb[8].mxu0 }
  0xeb   :  { %v2305_v42 = vpop.f32.mrb[10].mxu1  ;;  %2350 = vmatprep.subr.mxu0 %v2490_v23  ;;  %v2685_v49 = vpop.f32.mrb[9].mxu0 }
  0xec   :  { %v291_v43 = vpop.f32.mrb[11].mxu1  ;;  %2333 = vmatmul.mubr.msk.f32.vlgmr.msra.gmra.mrb[16].mxu1 %vm30_vm0, %v131_v36  ;;  %2343 = vmatmul.mubr.msk.f32.vlgmr.msra.gmra.mrb[12].mxu0 %vm30_vm0, %v141_v29 }
  0xed   :  { %2336 = vmatpush3.xpose.msk.msra.mxu1 %vm30_vm0, %v2299_v38  ;;  %2351 = vmatpush3.xpose.msk.msra.mxu0 %vm30_vm0, %v291_v43 }
  0xee   :  { %2337 = vmatprep.mubr.msk.f32.mxu1 %vm2491_vm1, %v2490_v23  ;;  %2352 = vmatprep.mubr.msk.f32.mxu0 %vm2491_vm1, %v2490_v23  ;;  %v2687_v50 = vpop.f32.mrb[10].mxu0 }
  0xef   :  { %2345 = vmatprep.subr.mxu1 %v2490_v23  ;;  %2360 = vmatprep.subr.mxu0 %v2490_v23  ;;  %v2689_v51 = vpop.f32.mrb[11].mxu0 }
  0xf0   :  { %2338 = vmatmul.mubr.msk.f32.vlgmr.msra.gmra.mrb[18].mxu1 %vm30_vm0, %v2285_v34  ;;  %2353 = vmatmul.mubr.msk.f32.vlgmr.msra.gmra.mrb[14].mxu0 %vm30_vm0, %v151_v33 }
  0xf1   :  { %2346 = vmatpush3.xpose.msk.msra.mxu1 %vm30_vm0, %v2302_v40  ;;  %2347 = vmatprep.mubr.msk.f32.mxu1 %vm2491_vm1, %v2490_v23 }
  0xf2   :  { %2355 = vmatprep.subr.mxu1 %v2490_v23  ;;  %2362 = vmatprep.mubr.msk.f32.mxu0 %vm2491_vm1, %v2490_v23 }
  0xf3   :  { %2361 = vmatpush3.msra.mxu0 %v401_v45 }
  0xf4   :  { %2348 = vmatmul.mubr.msk.f32.vlgmr.msra.gmra.mrb[20].mxu1 %vm30_vm0, %v2288_v28  ;;  %2370 = vmatprep.subr.mxu0 %v2490_v23 }
  0xf5   :  { %2356 = vmatpush3.xpose.msk.msra.mxu1 %vm30_vm0, %v2305_v42  ;;  %2357 = vmatprep.mubr.msk.f32.mxu1 %vm2491_vm1, %v2490_v23 }
  0xf6   :  { %2365 = vmatprep.subr.mxu1 %v2490_v23 }
  0xf8   :  { %2358 = vmatmul.mubr.msk.f32.vlgmr.msra.gmra.mrb[22].mxu1 %vm30_vm0, %v2291_v31 }
  0xf9   :  { %2367 = vmatprep.mubr.msk.f32.mxu1 %vm2491_vm1, %v2490_v23  ;;  %2366 = vmatpush3.msra.mxu1 %v2310_v44 }
  0xfa   :  { %2375 = vmatprep.subr.mxu1 %v2490_v23 }
 0x1b7   :  { %v512_v0 = vpop.f32.mrb[12].mxu1 }
 0x1b8   :  { %v1084_v1 = vadd.f32 %v1077_v63, %v512_v0  ;;  %v2324_v2 = vpop.f32.mrb[13].mxu1 }
 0x1ba   :  { %v1092_v3 = vmul.f32 0.17677669, %v1084_v1 }
 0x1bb   :  { %v588_v4 = vpop.f32.mrb[14].mxu1 }
 0x1bc   :  { %v1085_v6 = vadd.f32 %v1077_v63, %v588_v4  ;;  %v1100_v7 = vsel %vm30_vm0, %v1092_v3, -inf  ;;  %v2329_v8 = vpop.f32.mrb[15].mxu1 }
 0x1bd   :  { %1101 = vmax.xlane.f32.xlu1 %v1100_v7 }
 0x1be   :  { %v1093_v9 = vmul.f32 0.17677669, %v1085_v6 }
 0x1bf   :  { %v816_v10 = vpop.f32.mrb[12].mxu0  ;;  %v664_v12 = vpop.f32.mrb[16].mxu1 }
 0x1c0   :  { %v2344_v13 = vpop.f32.mrb[13].mxu0  ;;  %v1103_v14 = vsel %vm30_vm0, %v1093_v9, -inf  ;;  %v2334_v15 = vpop.f32.mrb[17].mxu1  ;;  %v1086_v19 = vadd.f32 %v1077_v63, %v664_v12  ;;  %v1088_v25 = vadd.f32 %v1081_v16, %v816_v10 }
 0x1c1   :  { %1104 = vmax.xlane.f32.xlu0 %v1103_v14 }
 0x1c2   :  { %v1094_v27 = vmul.f32 0.17677669, %v1086_v19  ;;  %v1096_v33 = vmul.f32 0.17677669, %v1088_v25 }
 0x1c3   :  { %v740_v17 = vpop.f32.mrb[18].mxu1  ;;  %v968_v18 = vpop.f32.mrb[14].mxu0 }
 0x1c4   :  { %v1087_v20 = vadd.f32 %v1077_v63, %v740_v17  ;;  %v2354_v21 = vpop.f32.mrb[15].mxu0  ;;  %v2339_v22 = vpop.f32.mrb[19].mxu1  ;;  %v1090_v28 = vadd.f32 %v1081_v16, %v968_v18  ;;  %v1106_v38 = vsel %vm30_vm0, %v1094_v27, -inf  ;;  %v1112_v41 = vsel %vm30_vm0, %v1096_v33, -inf }
 0x1c6   :  { %v1095_v24 = vmul.f32 0.17677669, %v1087_v20  ;;  %v1098_v35 = vmul.f32 0.17677669, %v1090_v28 }
 0x1c7   :  { %v892_v26 = vpop.f32.mrb[20].mxu1 }
 0x1c8   :  { %v1089_v29 = vadd.f32 %v1081_v16, %v892_v26  ;;  %v2349_v30 = vpop.f32.mrb[21].mxu1  ;;  %v1109_v31 = vsel %vm30_vm0, %v1095_v24, -inf  ;;  %v1118_v42 = vsel %vm30_vm0, %v1098_v35, -inf }
 0x1c9   :  { %1110 = vmax.xlane.f32.xlu0 %v1109_v31 }
 0x1ca   :  { %v1097_v32 = vmul.f32 0.17677669, %v1089_v29 }
 0x1cb   :  { %v1044_v34 = vpop.f32.mrb[22].mxu1 }
 0x1cc   :  { %v1091_v36 = vadd.f32 %v1081_v16, %v1044_v34  ;;  %v2359_v37 = vpop.f32.mrb[23].mxu1  ;;  %v1115_v39 = vsel %vm30_vm0, %v1097_v32, -inf }
 0x1cd   :  { %1107 = vmax.xlane.f32.xlu0 %v1106_v38  ;;  %1116 = vmax.xlane.f32.xlu1 %v1115_v39 }
 0x1ce   :  { %v1099_v40 = vmul.f32 0.17677669, %v1091_v36 }
 0x1d0   :  { %v1121_v43 = vsel %vm30_vm0, %v1099_v40, -inf }
 0x1d1   :  { %1113 = vmax.xlane.f32.xlu1 %v1112_v41  ;;  %1119 = vmax.xlane.f32.xlu0 %v1118_v42 }
 0x1d5   :  { %1122 = vmax.xlane.f32.xlu1 %v1121_v43 }
 0x24a   :  { %v1102_v44 = vpop.xlane.xlu1 %1101 }
 0x24b   :  { %v1124_v45 = vsub.f32 %v1092_v3, %v1102_v44 }
 0x24d   :  { %v1132_v54 = vmul.f32 1.442695, %v1124_v45 }
 0x24e   :  { %v1105_v52 = vpop.xlane.xlu0 %1104 }
 0x24f   :  { %v1125_v53 = vsub.f32 %v1093_v9, %v1105_v52  ;;  %v1773_v52 = vld [vmem:[%s2779_s3 + $0x8] sm:$0xff] }
 0x251   :  { %v1134_v55 = vmul.f32 1.442695, %v1125_v53  ;;  %v1772_v53 = vld [vmem:[%s2779_s3] sm:$0xff] }
 0x253   :  { %2434 = vpow2.f32 %v1134_v55 }
 0x254   :  { %2436 = vpow2.f32 %v1132_v54 }
 0x256   :  { %v1111_v56 = vpop.xlane.xlu0 %1110 }
 0x257   :  { %v1127_v57 = vsub.f32 %v1095_v24, %v1111_v56 }
 0x259   :  { %v1138_v58 = vmul.f32 1.442695, %v1127_v57 }
 0x25a   :  { %v1108_v59 = vpop.xlane.xlu0 %1107  ;;  %v1117_v60 = vpop.xlane.xlu1 %1116 }
 0x25b   :  { %2438 = vpow2.f32 %v1138_v58  ;;  %v1126_v61 = vsub.f32 %v1094_v27, %v1108_v59  ;;  %v1129_v62 = vsub.f32 %v1097_v32, %v1117_v60 }
 0x25d   :  { %v2435_v63 = vpop.eup %2434  ;;  %v1136_v0 = vmul.f32 1.442695, %v1126_v61  ;;  %v1142_v1 = vmul.f32 1.442695, %v1129_v62  ;;  %v1774_v61 = vld [vmem:[%s2779_s3 + $0x10] sm:$0xff] }
 0x25e   :  { %v1114_v2 = vpop.xlane.xlu1 %1113  ;;  %v1120_v4 = vpop.xlane.xlu0 %1119  ;;  %v1151_v3 = vsel %vm30_vm0, %v2435_v63, 0.0 }
 0x25f   :  { %v2437_v5 = vpop.eup %2436  ;;  %2440 = vpow2.f32 %v1136_v0  ;;  %v1128_v6 = vsub.f32 %v1096_v33, %v1114_v2  ;;  %v1130_v7 = vsub.f32 %v1098_v35, %v1120_v4  ;;  %1152 = vadd.xlane.f32.xlu0 %v1151_v3  ;;  %v1775_v4 = vld [vmem:[%s2779_s3 + $0x18] sm:$0xff]  ;;  %s2493_s3 = smov [#allocation2]  }
 0x260   :  { %2442 = vpow2.f32 %v1142_v1  ;;  %v1148_v11 = vsel %vm30_vm0, %v2437_v5, 0.0  ;;  %s2121_s6 = sshll.u32 %s2493_s3, 4  ;;  %s2122_s6 = int_to_ptr.vmem [resolvable:$true] %s2121_s6 }
 0x261   :  { %v1140_v8 = vmul.f32 1.442695, %v1128_v6  ;;  %v1144_v9 = vmul.f32 1.442695, %v1130_v7  ;;  %v2206_v6 = vld [vmem:[%s2780_s4] ss:$0 sm:$0xff]  ;;  %p2471_p1 = scmp.lt.s32.totalorder %s2122_s6, %s2122_s6 }
 0x262   :  { %v1123_v10 = vpop.xlane.xlu1 %1122  ;;  %s2466_s7 = scalar_lea.vmem %s2122_s6, 256 }
 0x263   :  { %2444 = vpow2.f32 %v1140_v8  ;;  %v1131_v12 = vsub.f32 %v1099_v40, %v1123_v10  ;;  %1149 = vadd.xlane.f32.xlu0 %v1148_v11  ;;  %p2467_p0 = scmp.ne.s32.totalorder %s2122_s6, %s2466_s7  ;;  %p2472_p2 = scmp.lt.s32.totalorder %s2466_s7, %s2466_s7 }
 0x264   :  { %2446 = vpow2.f32 %v1144_v9 }
 0x265   :  { %v2439_v13 = vpop.eup %2438  ;;  %v1146_v14 = vmul.f32 1.442695, %v1131_v12  ;;  %p2473_p3 = por %p2472_p2, %p2471_p1 }
 0x266   :  { %v1157_v15 = vsel %vm30_vm0, %v2439_v13, 0.0 }
 0x267   :  { %2448 = vpow2.f32 %v1146_v14  ;;  %1158 = vadd.xlane.f32.xlu1 %v1157_v15  ;;  %p2474_p4 = pnand %p2473_p3, %p2467_p0 }
 0x269   :  { %v2441_v16 = vpop.eup %2440 }
 0x26a   :  { %v2443_v17 = vpop.eup %2442  ;;  %v1154_v18 = vsel %vm30_vm0, %v2441_v16, 0.0 }
 0x26b   :  { %v1163_v19 = vsel %vm30_vm0, %v2443_v17, 0.0  ;;  %1155 = vadd.xlane.f32.xlu0 %v1154_v18 }
 0x26c   :  { %1164 = vadd.xlane.f32.xlu1 %v1163_v19 }
 0x26d   :  { %v2445_v20 = vpop.eup %2444 }
 0x26e   :  { %v2447_v21 = vpop.eup %2446  ;;  %v1160_v22 = vsel %vm30_vm0, %v2445_v20, 0.0 }
 0x26f   :  { %v1166_v24 = vsel %vm30_vm0, %v2447_v21, 0.0 }
 0x270   :  { %1161 = vadd.xlane.f32.xlu1 %v1160_v22  ;;  %1167 = vadd.xlane.f32.xlu0 %v1166_v24 }
 0x271   :  { %v2449_v25 = vpop.eup %2448 }
 0x272   :  { %v1169_v26 = vsel %vm30_vm0, %v2449_v25, 0.0 }
 0x274   :  { %1170 = vadd.xlane.f32.xlu1 %v1169_v26 }
 0x2ec   :  { %v1153_v27 = vpop.xlane.xlu0 %1152 }
 0x2ed   :  { %2450 = vrcp.f32 %v1153_v27 }
 0x2f0   :  { %v1150_v28 = vpop.xlane.xlu0 %1149 }
 0x2f1   :  { %2452 = vrcp.f32 %v1150_v28 }
 0x2f4   :  { %v1159_v29 = vpop.xlane.xlu1 %1158 }
 0x2f5   :  { %2454 = vrcp.f32 %v1159_v29 }
 0x2f7   :  { %v2451_v30 = vpop.eup %2450 }
 0x2f8   :  { %v1181_v31 = vmul.f32 %v2451_v30, %v2435_v63  ;;  %v1156_v32 = vpop.xlane.xlu0 %1155 }
 0x2f9   :  { %v1165_v33 = vpop.xlane.xlu1 %1164  ;;  %2456 = vrcp.f32 %v1156_v32 }
 0x2fa   :  { %2458 = vrcp.f32 %v1165_v33  ;;  %2368 = vmatmul.mubr.msk.f32.vlgmr.msra.gmra.mrb[24].mxu1 %vm30_vm0, %v1181_v31 }
 0x2fb   :  { %v2453_v34 = vpop.eup %2452  ;;  %2376 = vmatpush3.msra.mxu1 %v2678_v46  ;;  %2377 = vmatprep.mubr.msk.f32.mxu1 %vm2491_vm1, %v2490_v23 }
 0x2fc   :  { %v1180_v35 = vmul.f32 %v2453_v34, %v2437_v5  ;;  %2385 = vmatprep.subr.mxu1 %v2490_v23 }
 0x2fd   :  { %v1162_v36 = vpop.xlane.xlu1 %1161  ;;  %v1168_v37 = vpop.xlane.xlu0 %1167 }
 0x2fe   :  { %2460 = vrcp.f32 %v1162_v36  ;;  %2363 = vmatmul.mubr.msk.f32.vlgmr.msra.gmra.mrb[16].mxu0 %vm30_vm0, %v1180_v35 }
 0x2ff   :  { %v2455_v38 = vpop.eup %2454  ;;  %2371 = vmatpush3.msra.mxu0 %v2680_v47  ;;  %2372 = vmatprep.mubr.msk.f32.mxu0 %vm2491_vm1, %v2490_v23  ;;  %2462 = vrcp.f32 %v1168_v37 }
 0x300   :  { %v1183_v39 = vmul.f32 %v2455_v38, %v2439_v13  ;;  %2380 = vmatprep.subr.mxu0 %v2490_v23 }
 0x301   :  { %v1171_v46 = vpop.xlane.xlu1 %1170 }
 0x302   :  { %2464 = vrcp.f32 %v1171_v46  ;;  %2378 = vmatmul.mubr.msk.f32.vlgmr.msra.gmra.mrb[26].mxu1 %vm30_vm0, %v1183_v39 }
 0x303   :  { %v2457_v40 = vpop.eup %2456  ;;  %2386 = vmatpush3.msra.mxu1 %v2683_v48  ;;  %2387 = vmatprep.mubr.msk.f32.mxu1 %vm2491_vm1, %v2490_v23 }
 0x304   :  { %v2459_v41 = vpop.eup %2458  ;;  %v1182_v42 = vmul.f32 %v2457_v40, %v2441_v16  ;;  %2395 = vmatprep.subr.mxu1 %v2490_v23 }
 0x305   :  { %v1185_v47 = vmul.f32 %v2459_v41, %v2443_v17 }
 0x306   :  { %2373 = vmatmul.mubr.msk.f32.vlgmr.msra.gmra.mrb[18].mxu0 %vm30_vm0, %v1182_v42 }
 0x307   :  { %2381 = vmatpush3.msra.mxu0 %v2685_v49  ;;  %2388 = vmatmul.mubr.msk.f32.vlgmr.msra.gmra.mrb[28].mxu1 %vm30_vm0, %v1185_v47 }
 0x308   :  { %v2461_v43 = vpop.eup %2460  ;;  %2396 = vmatpush3.msra.mxu1 %v2687_v50  ;;  %2382 = vmatprep.mubr.msk.f32.mxu0 %vm2491_vm1, %v2490_v23 }
 0x309   :  { %v1184_v48 = vmul.f32 %v2461_v43, %v2445_v20  ;;  %2390 = vmatprep.subr.mxu0 %v2490_v23  ;;  %2397 = vmatprep.mubr.msk.f32.mxu1 %vm2491_vm1, %v2490_v23  ;;  %v2463_v44 = vpop.eup %2462 }
 0x30a   :  { %v1186_v49 = vmul.f32 %v2463_v44, %v2447_v21 }
 0x30b   :  { %2383 = vmatmul.mubr.msk.f32.vlgmr.msra.gmra.mrb[20].mxu0 %vm30_vm0, %v1184_v48 }
 0x30c   :  { %v2465_v45 = vpop.eup %2464  ;;  %2391 = vmatpush3.msra.mxu0 %v2689_v51  ;;  %2392 = vmatprep.mubr.msk.f32.mxu0 %vm2491_vm1, %v2490_v23 }
 0x30d   :  { %v1187_v50 = vmul.f32 %v2465_v45, %v2449_v25  ;;  %2400 = vmatprep.subr.mxu0 %v1773_v52 }
 0x30f   :  { %2393 = vmatmul.mubr.msk.f32.vlgmr.msra.gmra.mrb[22].mxu0 %vm30_vm0, %v1186_v49  ;;  %2398 = vmatmul.mubr.msk.f32.vlgmr.msra.gmra.mrb[30].mxu1 %vm30_vm0, %v1187_v50 }
 0x310   :  { %2401 = vmatpush3.msra.mxu0 %v1773_v52 }
 0x311   :  { %2405 = vmatprep.subr.mxu0 %v1772_v53 }
 0x3cd   :  { %v1330_v51 = vpop.f32.mrb[24].mxu1 }
 0x3ce   :  { %v2369_v54 = vpop.f32.mrb[25].mxu1  ;;  %2402 = vmatprep.mubr.msk.f32.mxu0 %vm30_vm0, %v1330_v51 }
 0x3d1   :  { %v1257_v23 = vpop.f32.mrb[16].mxu0 }
 0x3d2   :  { %v2364_v55 = vpop.f32.mrb[17].mxu0 }
 0x3d5   :  { %v1476_v56 = vpop.f32.mrb[26].mxu1 }
 0x3d6   :  { %v2379_v57 = vpop.f32.mrb[27].mxu1 }
 0x3d9   :  { %v1403_v58 = vpop.f32.mrb[18].mxu0 }
 0x3da   :  { %v1622_v59 = vpop.f32.mrb[28].mxu1  ;;  %v2374_v60 = vpop.f32.mrb[19].mxu0 }
 0x3db   :  { %v2389_v62 = vpop.f32.mrb[29].mxu1  ;;  %2403 = vmatmul.mubr.msk.f32.vlgmr.msra.gmra.mrb[24].mxu0 %vm30_vm0, %v1622_v59 }
 0x3dc   :  { %2407 = vmatprep.mubr.msk.f32.mxu0 %vm30_vm0, %v1257_v23  ;;  %2406 = vmatpush3.msra.mxu0 %v1772_v53 }
 0x3dd   :  { %2410 = vmatprep.subr.mxu0 %v1774_v61 }
 0x3de   :  { %v1549_v63 = vpop.f32.mrb[20].mxu0 }
 0x3df   :  { %v2384_v0 = vpop.f32.mrb[21].mxu0 }
 0x3e2   :  { %v1695_v1 = vpop.f32.mrb[22].mxu0  ;;  %v1768_v2 = vpop.f32.mrb[30].mxu1 }
 0x3e3   :  { %v2394_v3 = vpop.f32.mrb[23].mxu0  ;;  %v2399_v5 = vpop.f32.mrb[31].mxu1  ;;  %2408 = vmatmul.mubr.msk.f32.vlgmr.msra.gmra.mrb[24].mxu0 %vm30_vm0, %v1549_v63 }
 0x3e4   :  { %2412 = vmatprep.mubr.msk.f32.mxu0 %vm30_vm0, %v1403_v58  ;;  %2411 = vmatpush3.msra.mxu0 %v1774_v61 }
 0x3e5   :  { %2415 = vmatprep.subr.mxu0 %v1775_v4 }
 0x3eb   :  { %2413 = vmatmul.mubr.msk.f32.vlgmr.msra.gmra.mrb[24].mxu0 %vm30_vm0, %v1695_v1 }
 0x3ec   :  { %2417 = vmatprep.mubr.msk.f32.mxu0 %vm30_vm0, %v1476_v56  ;;  %2416 = vmatpush3.msra.mxu0 %v1775_v4 }
 0x3f3   :  { %2418 = vmatmul.mubr.msk.f32.vlgmr.msra.gmra.mrb[24].mxu0 %vm30_vm0, %v1768_v2 }
 0x4c6   :  { %v2419_v7 = vpop.f32.mrb[24].mxu0 }
 0x4c7   :  { %v2112_v8 = vadd.f32 %v2419_v7, %v2206_v6  ;;  %v2093_v9 = vpop.f32.mrb[25].mxu0 }
 0x4c8   :  { %v2111_v10 = vadd.f32 %v2206_v6, %v2093_v9 }
 0x4c9   :  { %2115 = vst.msk [vmem:[#allocation2 + $0x8] sm:$0xff] %vm2113_vm3, %v2112_v8 }
 0x4ca   :  { %2114 = vst.msk [vmem:[#allocation2] sm:$0xff] %vm2113_vm3, %v2111_v10 }
 0x4cb   :  { %2477 = shalt.err (!%p2474_p4)
}
 0x4cc   :  { %s2478_s4 = scalar_lea.hbm %s2781_s5, 256 }
 0x4cd   :  { %p2479_p5 = scmp.ne.s32.totalorder %s2781_s5, %s2478_s4  ;;  %p2482_p6 = scmp.lt.u32.totalorder %s2478_s4, %s2781_s5 }
 0x4cf   :  { %p2484_p7 = pnand %p2482_p6, %p2479_p5 }
 0x4d1   :  { %2487 = shalt.err (!%p2484_p7)
}
 0x4d2   :  { %s2494_s13 = smov 128   ;;  %s2495_s14 = smov 8  }
 0x4d3   :  { %2127 = dma.vmem_to_hbm [thread:$0]  %s2122_s6, 256, %s2781_s5, [#allocation3], %s2494_s13, %s2494_s13, %s2495_s14  }
 0x4d4   :  { %2488 = dma.done.wait [#allocation3], 256  }
 0x4d5   :  { %2489 = vsyncadd [#allocation3], 4294967040 }
 0x4d6   :  { %2131 = vsyncpa [#allocation3], 1 }

</bundles_post_ra>
